<compile_context>
chip_gen: v6e
topology: v6e:2x2x1
jax: 0.10.0
libtpu: 0.0.40
codegen_flags: <defaults>
</compile_context>

<pallas_src>
import functools

import jax
import jax.numpy as jnp
from jax.experimental import pallas as pl
from jax.experimental.pallas import tpu as pltpu


def _round_up(x: int, m: int) -> int:
    return ((x + m - 1) // m) * m


# ----------------------------------------------------------------------------
# Tile selection (per-generation notes):
#   v5e : 128x128 MXU, 16 MiB scoped VMEM default  -> tn multiples of 128,
#         tk <= 1024 in f32.
#   v6e : 256x256 MXU, 32 MiB scoped VMEM default  -> tn multiples of 256 when
#         num is large, tm snapped to 128/256 for B >= 128.
#   v7x : 256x256 MXU, 64 MiB physical VMEM        -> same tn/tm alignment,
#         keep tiles well under ~32 MiB so double-buffering survives.
# The defaults below satisfy all three simultaneously.
# ----------------------------------------------------------------------------
def _choose_tn(num: int) -> int:
    if num <= 512:
        return _round_up(num, 128)      # one N block for small heads
    return 512                          # multiple of 256 (v6e/v7x MXU width)


def _choose_tk(f: int, itemsize: int) -> int:
    f_pad = _round_up(f, 128)
    cap = 1024 if itemsize >= 4 else 2048
    return min(f_pad, cap)


def _choose_tm(B: int) -> int:
    if B <= 128:
        return max(8, _round_up(B, 8))  # single M block, weight streamed once
    if B <= 512:
        return _round_up(B, 128)        # single M block, MXU-row aligned
    return 256


# ----------------------------------------------------------------------------
# Kernels
# ----------------------------------------------------------------------------
def _linear_single_k_kernel(x_ref, w_ref, b_ref, o_ref):
    # x_ref: (tm, K)  w_ref: (K, tn)  b_ref: (1, tn)  o_ref: (tm, tn)
    acc = jnp.dot(x_ref[...], w_ref[...], preferred_element_type=jnp.float32)
    o_ref[...] = (acc + b_ref[...]).astype(o_ref.dtype)


def _linear_multi_k_kernel(x_ref, w_ref, b_ref, o_ref, acc_ref):
    # x_ref: (tm, tk)  w_ref: (tk, tn)  b_ref: (1, tn)
    # o_ref: (tm, tn)  acc_ref: (tm, tn) f32, persists across the K axis.
    k = pl.program_id(2)
    partial = jnp.dot(x_ref[...], w_ref[...], preferred_element_type=jnp.float32)

    @pl.when(k == 0)
    def _():
        acc_ref[...] = partial            # no zero-fill + '+=' on the first step

    @pl.when(k > 0)
    def _():
        acc_ref[...] += partial

    @pl.when(k == pl.num_programs(2) - 1)
    def _():
        o_ref[...] = (acc_ref[...] + b_ref[...]).astype(o_ref.dtype)


# ----------------------------------------------------------------------------
# One-time parameter preparation (run OUTSIDE the per-step hot path).
# ----------------------------------------------------------------------------
def prepare_classifier_params(weight, bias, dtype=None):
    """Transpose (num, f) -> (f, num) and zero-pad to tile multiples, once.

    dtype: optional compute dtype for the weight (e.g. jnp.bfloat16 to halve
           the dominant HBM stream).  Accumulation is always f32.
    """
    num, f = weight.shape
    if dtype is None:
        dtype = weight.dtype
    itemsize = jnp.dtype(dtype).itemsize

    tn = _choose_tn(num)
    tk = _choose_tk(f, itemsize)
    n_pad = _round_up(num, tn)
    k_pad = _round_up(f, tk)

    w_t = (
        jnp.zeros((k_pad, n_pad), dtype)
        .at[:f, :num]
        .set(jnp.transpose(weight).astype(dtype))
    )
    b_row = jnp.zeros((1, n_pad), jnp.float32).at[0, :num].set(bias.astype(jnp.float32))

    return {"w_t": w_t, "b": b_row, "num": num, "f": f, "tn": tn, "tk": tk}


# ----------------------------------------------------------------------------
# Forward pass
# ----------------------------------------------------------------------------
def classifier_forward(x, w_t, b_row, *, num, f, tn, tk):
    """y = x.reshape(B, -1) @ W^T + b, with W pre-transposed/padded in w_t.

    x:     (B, ...) any trailing shape, flattened to (B, f)
    w_t:   (k_pad, n_pad) pre-transposed, zero-padded weight
    b_row: (1, n_pad) zero-padded bias (f32)
    """
    B = x.shape[0]
    x_flat = x.reshape(B, -1)
    assert x_flat.shape[1] == f, "flattened feature dim does not match weight"

    k_pad, n_pad = w_t.shape
    compute_dtype = w_t.dtype
    out_dtype = x_flat.dtype

    tm = _choose_tm(B)
    m_pad = _round_up(B, tm)

    # Pad only the (small) activation per call; padded K columns are zero so
    # they contribute nothing to the contraction.
    x_p = (
        jnp.zeros((m_pad, k_pad), compute_dtype)
        .at[:B, :f]
        .set(x_flat.astype(compute_dtype))
    )

    grid_m = m_pad // tm
    grid_n = n_pad // tn
    grid_k = k_pad // tk

    # VMEM budget from the chosen tiles (double-buffered inputs/outputs).
    isz = jnp.dtype(compute_dtype).itemsize
    osz = jnp.dtype(out_dtype).itemsize
    needed = 2 * (tm * tk * isz + tk * tn * isz + tn * 4 + tm * tn * osz)
    needed += tm * tn * 4  # accumulator scratch (multi-K path)
    vmem_limit = min(int(needed * 3 // 2) + (4 << 20), 32 << 20)

    if grid_k == 1:
        # Fast path: whole K fits one tile -> no accumulator, no K loop.
        out_p = pl.pallas_call(
            _linear_single_k_kernel,
            out_shape=jax.ShapeDtypeStruct((m_pad, n_pad), out_dtype),
            grid_spec=pltpu.PrefetchScalarGridSpec(
                num_scalar_prefetch=0,
                grid=(grid_m, grid_n),
                in_specs=[
                    pl.BlockSpec((tm, k_pad), lambda i, j: (i, 0)),   # x
                    pl.BlockSpec((k_pad, tn), lambda i, j: (0, j)),   # W^T
                    pl.BlockSpec((1, tn), lambda i, j: (0, j)),       # bias
                ],
                out_specs=pl.BlockSpec((tm, tn), lambda i, j: (i, j)),
            ),
            compiler_params=pltpu.CompilerParams(
                dimension_semantics=("parallel", "parallel"),
                vmem_limit_bytes=vmem_limit,
            ),
        )(x_p, w_t, b_row)
    else:
        out_p = pl.pallas_call(
            _linear_multi_k_kernel,
            out_shape=jax.ShapeDtypeStruct((m_pad, n_pad), out_dtype),
            grid_spec=pltpu.PrefetchScalarGridSpec(
                num_scalar_prefetch=0,
                grid=(grid_m, grid_n, grid_k),
                in_specs=[
                    pl.BlockSpec((tm, tk), lambda i, j, k: (i, k)),   # x
                    pl.BlockSpec((tk, tn), lambda i, j, k: (k, j)),   # W^T
                    pl.BlockSpec((1, tn), lambda i, j, k: (0, j)),    # bias
                ],
                out_specs=pl.BlockSpec((tm, tn), lambda i, j, k: (i, j)),
                scratch_shapes=[pltpu.VMEM((tm, tn), jnp.float32)],
            ),
            compiler_params=pltpu.CompilerParams(
                # K (reduction/accumulator axis) stays last and "arbitrary".
                dimension_semantics=("parallel", "parallel", "arbitrary"),
                vmem_limit_bytes=vmem_limit,
            ),
        )(x_p, w_t, b_row)

    return out_p[:B, :num]


if __name__ == "__main__":
    # Small shapes consistent with the module: x is NCHW (2, 4, 16, 16),
    # so f = 4*16*16 = 1024; num_classes = 10.
    B, C, H, W = 2, 4, 16, 16
    f = C * H * W
    num = 10

    key = jax.random.PRNGKey(0)
    kx, kw, kb = jax.random.split(key, 3)

    x = jax.random.normal(kx, (B, C, H, W), dtype=jnp.float32)
    # Deterministic parameter init (PyTorch Linear-style uniform bound).
    bound = 1.0 / (f ** 0.5)
    weight = jax.random.uniform(kw, (num, f), jnp.float32, -bound, bound)
    bias = jax.random.uniform(kb, (num,), jnp.float32, -bound, bound)

    # One-time prep (pad + transpose) outside the hot path.
    params = prepare_classifier_params(weight, bias)

    fwd = jax.jit(
        functools.partial(
            classifier_forward,
            num=params["num"],
            f=params["f"],
            tn=params["tn"],
            tk=params["tk"],
        )
    )
    y = fwd(x, params["w_t"], params["b"])
    jax.block_until_ready(y)

    # Reference check against plain JAX (same math as nn.Linear).
    y_ref = x.reshape(B, -1) @ weight.T + bias
    assert y.shape == (B, num)
    assert jnp.allclose(y, y_ref, atol=1e-5, rtol=1e-5)

    print("KERNEL_OK")
</pallas_src>

<mosaic_0001>
module attributes {stable_mosaic.version = 11 : i64} {
  func.func @_linear_single_k_kernel(%arg0: i32, %arg1: i32, %arg2: memref<8x1024xf32, #tpu.memory_space<vmem>>, %arg3: memref<1024x128xf32, #tpu.memory_space<vmem>>, %arg4: memref<1x128xf32, #tpu.memory_space<vmem>>, %arg5: memref<8x128xf32, #tpu.memory_space<vmem>>) attributes {dimension_semantics = [#tpu.dimension_semantics<parallel>, #tpu.dimension_semantics<parallel>], iteration_bounds = array<i64: 1, 1>, scalar_prefetch = 0 : i64, scratch_operands = 0 : i64, tpu.core_type = #tpu.core_type<tc>, window_params = [{transform_indices = @transform_0, window_bounds = array<i64: 8, 1024>}, {transform_indices = @transform_1, window_bounds = array<i64: 1024, 128>}, {transform_indices = @transform_2, window_bounds = array<i64: 1, 128>}, {transform_indices = @transform_3, window_bounds = array<i64: 8, 128>}]} {
    %c0 = arith.constant 0 : index
    %c0_0 = arith.constant 0 : index
    %0 = vector.load %arg2[%c0, %c0_0] : memref<8x1024xf32, #tpu.memory_space<vmem>>, vector<8x1024xf32>
    %c0_1 = arith.constant 0 : index
    %c0_2 = arith.constant 0 : index
    %1 = vector.load %arg3[%c0_1, %c0_2] : memref<1024x128xf32, #tpu.memory_space<vmem>>, vector<1024x128xf32>
    %cst = arith.constant dense<0.000000e+00> : vector<8x128xf32>
    %2 = tpu.matmul %0, %1, %cst {dimension_numbers = #tpu.dot_dimension_numbers<[1], [0], [0], [1], [0, 0, 1, 1], [], []>} : vector<8x1024xf32>, vector<1024x128xf32>, vector<8x128xf32> -> vector<8x128xf32>
    %c0_3 = arith.constant 0 : index
    %c0_4 = arith.constant 0 : index
    %3 = vector.load %arg4[%c0_3, %c0_4] : memref<1x128xf32, #tpu.memory_space<vmem>>, vector<1x128xf32>
    %4 = vector.broadcast %3 : vector<1x128xf32> to vector<8x128xf32>
    %5 = arith.addf %2, %4 : vector<8x128xf32>
    %c0_5 = arith.constant 0 : index
    %c0_6 = arith.constant 0 : index
    %6 = vector.load %arg5[%c0_5, %c0_6] : memref<8x128xf32, #tpu.memory_space<vmem>>, vector<8x128xf32>
    tpu.vector_store %arg5[%c0_5, %c0_6], %5 {strides = array<i32>} : memref<8x128xf32, #tpu.memory_space<vmem>>, vector<8x128xf32>,
    return
  }
  func.func @transform_0(%arg0: i32, %arg1: i32) -> (i32, i32) {
    %c0_i32 = arith.constant 0 : i32
    %c0_i32_0 = arith.constant 0 : i32
    return %arg0, %c0_i32 : i32, i32
  }
  func.func @transform_1(%arg0: i32, %arg1: i32) -> (i32, i32) {
    %c0_i32 = arith.constant 0 : i32
    %c0_i32_0 = arith.constant 0 : i32
    return %c0_i32, %arg1 : i32, i32
  }
  func.func @transform_2(%arg0: i32, %arg1: i32) -> (i32, i32) {
    %c0_i32 = arith.constant 0 : i32
    %c0_i32_0 = arith.constant 0 : i32
    return %c0_i32, %arg1 : i32, i32
  }
  func.func @transform_3(%arg0: i32, %arg1: i32) -> (i32, i32) {
    %c0_i32 = arith.constant 0 : i32
    return %arg0, %arg1 : i32, i32
  }
}

</mosaic_0001>

<bundles_post_ra>
// kernel: classifier_forward.1
= control target key start
LH: loop header
LB: loop body
LE: loop exit
PB: predicated region body
PF: predicated region fallthrough
CT: control target
= control target key end

     0   :  { %8 = vsyncpa [#allocation3], 0  ;;  %s623_s12 = smov [#allocation2]   ;;  %s679_s0 = inlined_call_operand.vmem [shape: f32[8,1024], index: 0, kind: input, shape index: {}]   ;;  %s680_s1 = inlined_call_operand.hbm [shape: f32[1024,128], index: 1, kind: input, shape index: {}]   ;;  %s681_s2 = inlined_call_operand.vmem [shape: f32[1,128], index: 2, kind: input, shape index: {}]   ;;  %s682_s3 = inlined_call_operand.vmem [shape: f32[8,128], index: 3, kind: output, shape index: {}]  }
   0x1   :  { %s16_s13 = sshll.u32 %s623_s12, 4  ;;  %s17_s13 = int_to_ptr.vmem [resolvable:$true] %s16_s13 }
   0x2   :  { %s609_s14 = scalar_lea.vmem %s17_s13, 16384  ;;  %p614_p1 = scmp.lt.s32.totalorder %s17_s13, %s17_s13 }
   0x3   :  { %p610_p0 = scmp.ne.s32.totalorder %s17_s13, %s609_s14  ;;  %p615_p2 = scmp.lt.s32.totalorder %s609_s14, %s609_s14 }
   0x5   :  { %p616_p3 = por %p615_p2, %p614_p1 }
   0x7   :  { %p617_p4 = pnand %p616_p3, %p610_p0 }
   0x9   :  { %620 = shalt.err (!%p617_p4)
}
   0xa   :  { %s624_s15 = smov 128   ;;  %s625_s16 = smov 8  }
   0xb   :  { %22 = dma.hbm_to_vmem [thread:$0]  %s680_s1, 16384, %s17_s13, [#allocation3], %s624_s15, %s624_s15, %s625_s16  }
   0xc   :  { %621 = dma.done.wait [#allocation3], 16384  }
   0xd   :  { %622 = vsyncadd [#allocation3], 4294950912  ;;  %v67_v0 = vld [vmem:[#allocation2 + $0xf8] sm:$0xff]  ;;  %v66_v4 = vld [vmem:[#allocation2 + $0xf0] sm:$0xff] }
   0xe   :  { %v99_v1 = vld [vmem:[#allocation2 + $0x1f8] sm:$0xff]  ;;  %458 = vmatprep.subr.mxu0 %v67_v0  ;;  %v98_v5 = vld [vmem:[#allocation2 + $0x1f0] sm:$0xff]  ;;  %v65_v8 = vld [vmem:[#allocation2 + $0xe8] sm:$0xff] }
   0xf   :  { %v51_v2 = vld [vmem:[#allocation2 + $0x78] sm:$0xff]  ;;  %493 = vmatprep.subr.mxu1 %v99_v1  ;;  %v50_v6 = vld [vmem:[#allocation2 + $0x70] sm:$0xff]  ;;  %v97_v9 = vld [vmem:[#allocation2 + $0x1e8] sm:$0xff] }
  0x10   :  { %v83_v3 = vld [vmem:[#allocation2 + $0x178] sm:$0xff]  ;;  %459 = vmatpush3.msra.mxu0 %v51_v2  ;;  %v82_v7 = vld [vmem:[#allocation2 + $0x170] sm:$0xff]  ;;  %v49_v10 = vld [vmem:[#allocation2 + $0x68] sm:$0xff] }
  0x11   :  { %494 = vmatpush3.msra.mxu1 %v83_v3  ;;  %460 = vmatprep.subr.mxu0 %v66_v4  ;;  %v81_v11 = vld [vmem:[#allocation2 + $0x168] sm:$0xff]  ;;  %v64_v12 = vld [vmem:[#allocation2 + $0xe0] sm:$0xff]  ;;  %v63_v16 = vld [vmem:[#allocation2 + $0xd8] sm:$0xff] }
  0x12   :  { %495 = vmatprep.subr.mxu1 %v98_v5  ;;  %461 = vmatpush3.msra.mxu0 %v50_v6  ;;  %v96_v13 = vld [vmem:[#allocation2 + $0x1e0] sm:$0xff]  ;;  %v95_v17 = vld [vmem:[#allocation2 + $0x1d8] sm:$0xff]  ;;  %v62_v20 = vld [vmem:[#allocation2 + $0xd0] sm:$0xff] }
  0x13   :  { %496 = vmatpush3.msra.mxu1 %v82_v7  ;;  %462 = vmatprep.subr.mxu0 %v65_v8  ;;  %v48_v14 = vld [vmem:[#allocation2 + $0x60] sm:$0xff]  ;;  %v47_v18 = vld [vmem:[#allocation2 + $0x58] sm:$0xff]  ;;  %v94_v21 = vld [vmem:[#allocation2 + $0x1d0] sm:$0xff] }
  0x14   :  { %497 = vmatprep.subr.mxu1 %v97_v9  ;;  %v80_v15 = vld [vmem:[#allocation2 + $0x160] sm:$0xff]  ;;  %463 = vmatpush3.msra.mxu0 %v49_v10  ;;  %v79_v19 = vld [vmem:[#allocation2 + $0x158] sm:$0xff]  ;;  %v46_v22 = vld [vmem:[#allocation2 + $0x50] sm:$0xff] }
  0x15   :  { %498 = vmatpush3.msra.mxu1 %v81_v11  ;;  %464 = vmatprep.subr.mxu0 %v64_v12  ;;  %v78_v23 = vld [vmem:[#allocation2 + $0x150] sm:$0xff]  ;;  %v61_v24 = vld [vmem:[#allocation2 + $0xc8] sm:$0xff]  ;;  %v60_v28 = vld [vmem:[#allocation2 + $0xc0] sm:$0xff] }
  0x16   :  { %499 = vmatprep.subr.mxu1 %v96_v13  ;;  %465 = vmatpush3.msra.mxu0 %v48_v14  ;;  %v93_v25 = vld [vmem:[#allocation2 + $0x1c8] sm:$0xff]  ;;  %v92_v29 = vld [vmem:[#allocation2 + $0x1c0] sm:$0xff]  ;;  %v59_v32 = vld [vmem:[#allocation2 + $0xb8] sm:$0xff] }
  0x17   :  { %500 = vmatpush3.msra.mxu1 %v80_v15  ;;  %466 = vmatprep.subr.mxu0 %v63_v16  ;;  %v45_v26 = vld [vmem:[#allocation2 + $0x48] sm:$0xff]  ;;  %v44_v30 = vld [vmem:[#allocation2 + $0x40] sm:$0xff]  ;;  %v91_v33 = vld [vmem:[#allocation2 + $0x1b8] sm:$0xff] }
  0x18   :  { %501 = vmatprep.subr.mxu1 %v95_v17  ;;  %467 = vmatpush3.msra.mxu0 %v47_v18  ;;  %v77_v27 = vld [vmem:[#allocation2 + $0x148] sm:$0xff]  ;;  %v76_v31 = vld [vmem:[#allocation2 + $0x140] sm:$0xff]  ;;  %v43_v34 = vld [vmem:[#allocation2 + $0x38] sm:$0xff] }
  0x19   :  { %502 = vmatpush3.msra.mxu1 %v79_v19  ;;  %468 = vmatprep.subr.mxu0 %v62_v20  ;;  %v75_v35 = vld [vmem:[#allocation2 + $0x138] sm:$0xff]  ;;  %v58_v36 = vld [vmem:[#allocation2 + $0xb0] sm:$0xff]  ;;  %v57_v40 = vld [vmem:[#allocation2 + $0xa8] sm:$0xff] }
  0x1a   :  { %503 = vmatprep.subr.mxu1 %v94_v21  ;;  %469 = vmatpush3.msra.mxu0 %v46_v22  ;;  %v90_v37 = vld [vmem:[#allocation2 + $0x1b0] sm:$0xff]  ;;  %v89_v41 = vld [vmem:[#allocation2 + $0x1a8] sm:$0xff]  ;;  %v56_v44 = vld [vmem:[#allocation2 + $0xa0] sm:$0xff] }
  0x1b   :  { %504 = vmatpush3.msra.mxu1 %v78_v23  ;;  %470 = vmatprep.subr.mxu0 %v61_v24  ;;  %v42_v38 = vld [vmem:[#allocation2 + $0x30] sm:$0xff]  ;;  %v41_v42 = vld [vmem:[#allocation2 + $0x28] sm:$0xff]  ;;  %v88_v45 = vld [vmem:[#allocation2 + $0x1a0] sm:$0xff] }
  0x1c   :  { %505 = vmatprep.subr.mxu1 %v93_v25  ;;  %471 = vmatpush3.msra.mxu0 %v45_v26  ;;  %v74_v39 = vld [vmem:[#allocation2 + $0x130] sm:$0xff]  ;;  %v73_v43 = vld [vmem:[#allocation2 + $0x128] sm:$0xff]  ;;  %v40_v46 = vld [vmem:[#allocation2 + $0x20] sm:$0xff] }
  0x1d   :  { %506 = vmatpush3.msra.mxu1 %v77_v27  ;;  %472 = vmatprep.subr.mxu0 %v60_v28  ;;  %v72_v47 = vld [vmem:[#allocation2 + $0x120] sm:$0xff]  ;;  %v55_v48 = vld [vmem:[#allocation2 + $0x98] sm:$0xff]  ;;  %v54_v52 = vld [vmem:[#allocation2 + $0x90] sm:$0xff] }
  0x1e   :  { %507 = vmatprep.subr.mxu1 %v92_v29  ;;  %473 = vmatpush3.msra.mxu0 %v44_v30  ;;  %v87_v49 = vld [vmem:[#allocation2 + $0x198] sm:$0xff]  ;;  %v86_v53 = vld [vmem:[#allocation2 + $0x190] sm:$0xff]  ;;  %v53_v56 = vld [vmem:[#allocation2 + $0x88] sm:$0xff] }
  0x1f   :  { %508 = vmatpush3.msra.mxu1 %v76_v31  ;;  %474 = vmatprep.subr.mxu0 %v59_v32  ;;  %v39_v50 = vld [vmem:[#allocation2 + $0x18] sm:$0xff]  ;;  %v38_v54 = vld [vmem:[#allocation2 + $0x10] sm:$0xff]  ;;  %v85_v57 = vld [vmem:[#allocation2 + $0x188] sm:$0xff] }
  0x20   :  { %509 = vmatprep.subr.mxu1 %v91_v33  ;;  %475 = vmatpush3.msra.mxu0 %v43_v34  ;;  %v71_v51 = vld [vmem:[#allocation2 + $0x118] sm:$0xff]  ;;  %v70_v55 = vld [vmem:[#allocation2 + $0x110] sm:$0xff]  ;;  %v37_v58 = vld [vmem:[#allocation2 + $0x8] sm:$0xff] }
  0x21   :  { %510 = vmatpush3.msra.mxu1 %v75_v35  ;;  %476 = vmatprep.subr.mxu0 %v58_v36  ;;  %v69_v59 = vld [vmem:[#allocation2 + $0x108] sm:$0xff]  ;;  %v52_v60 = vld [vmem:[#allocation2 + $0x80] sm:$0xff]  ;;  %v31_v2 = vld [vmem:[%s679_s0 + $0x18] sm:$0xff] }
  0x22   :  { %511 = vmatprep.subr.mxu1 %v90_v37  ;;  %477 = vmatpush3.msra.mxu0 %v42_v38  ;;  %v84_v61 = vld [vmem:[#allocation2 + $0x180] sm:$0xff]  ;;  %v29_v63 = vld [vmem:[%s679_s0 + $0x8] sm:$0xff]  ;;  %v131_v3 = vld [vmem:[#allocation2 + $0x2f8] sm:$0xff] }
  0x23   :  { %512 = vmatpush3.msra.mxu1 %v74_v39  ;;  %478 = vmatprep.subr.mxu0 %v57_v40  ;;  %v36_v62 = vld [vmem:[#allocation2] sm:$0xff]  ;;  %v163_v4 = vld [vmem:[#allocation2 + $0x3f8] sm:$0xff]  ;;  %v30_v5 = vld [vmem:[%s679_s0 + $0x10] sm:$0xff] }
  0x24   :  { %513 = vmatprep.subr.mxu1 %v89_v41  ;;  %479 = vmatpush3.msra.mxu0 %v41_v42  ;;  %v68_v0 = vld [vmem:[#allocation2 + $0x100] sm:$0xff]  ;;  %v115_v6 = vld [vmem:[#allocation2 + $0x278] sm:$0xff]  ;;  %v130_v8 = vld [vmem:[#allocation2 + $0x2f0] sm:$0xff] }
  0x25   :  { %514 = vmatpush3.msra.mxu1 %v73_v43  ;;  %480 = vmatprep.subr.mxu0 %v56_v44  ;;  %v28_v1 = vld [vmem:[%s679_s0] sm:$0xff]  ;;  %v147_v7 = vld [vmem:[#allocation2 + $0x378] sm:$0xff]  ;;  %v162_v9 = vld [vmem:[#allocation2 + $0x3f0] sm:$0xff] }
  0x26   :  { %515 = vmatprep.subr.mxu1 %v88_v45  ;;  %481 = vmatpush3.msra.mxu0 %v40_v46  ;;  %v114_v10 = vld [vmem:[#allocation2 + $0x270] sm:$0xff]  ;;  %v129_v12 = vld [vmem:[#allocation2 + $0x2e8] sm:$0xff]  ;;  %v128_v16 = vld [vmem:[#allocation2 + $0x2e0] sm:$0xff] }
  0x27   :  { %516 = vmatpush3.msra.mxu1 %v72_v47  ;;  %482 = vmatprep.subr.mxu0 %v55_v48  ;;  %v146_v11 = vld [vmem:[#allocation2 + $0x370] sm:$0xff]  ;;  %v161_v13 = vld [vmem:[#allocation2 + $0x3e8] sm:$0xff]  ;;  %v160_v17 = vld [vmem:[#allocation2 + $0x3e0] sm:$0xff] }
  0x28   :  { %517 = vmatprep.subr.mxu1 %v87_v49  ;;  %483 = vmatpush3.msra.mxu0 %v39_v50  ;;  %v113_v14 = vld [vmem:[#allocation2 + $0x268] sm:$0xff]  ;;  %v112_v18 = vld [vmem:[#allocation2 + $0x260] sm:$0xff]  ;;  %v127_v20 = vld [vmem:[#allocation2 + $0x2d8] sm:$0xff] }
  0x29   :  { %518 = vmatpush3.msra.mxu1 %v71_v51  ;;  %484 = vmatprep.subr.mxu0 %v54_v52  ;;  %v145_v15 = vld [vmem:[#allocation2 + $0x368] sm:$0xff]  ;;  %v144_v19 = vld [vmem:[#allocation2 + $0x360] sm:$0xff]  ;;  %v159_v21 = vld [vmem:[#allocation2 + $0x3d8] sm:$0xff] }
  0x2a   :  { %519 = vmatprep.subr.mxu1 %v86_v53  ;;  %485 = vmatpush3.msra.mxu0 %v38_v54  ;;  %v111_v22 = vld [vmem:[#allocation2 + $0x258] sm:$0xff]  ;;  %v126_v24 = vld [vmem:[#allocation2 + $0x2d0] sm:$0xff]  ;;  %v125_v28 = vld [vmem:[#allocation2 + $0x2c8] sm:$0xff] }
  0x2b   :  { %520 = vmatpush3.msra.mxu1 %v70_v55  ;;  %486 = vmatprep.subr.mxu0 %v53_v56  ;;  %v143_v23 = vld [vmem:[#allocation2 + $0x358] sm:$0xff]  ;;  %v158_v25 = vld [vmem:[#allocation2 + $0x3d0] sm:$0xff]  ;;  %v157_v29 = vld [vmem:[#allocation2 + $0x3c8] sm:$0xff] }
  0x2c   :  { %521 = vmatprep.subr.mxu1 %v85_v57  ;;  %487 = vmatpush3.msra.mxu0 %v37_v58  ;;  %v110_v26 = vld [vmem:[#allocation2 + $0x250] sm:$0xff]  ;;  %v109_v30 = vld [vmem:[#allocation2 + $0x248] sm:$0xff]  ;;  %v124_v32 = vld [vmem:[#allocation2 + $0x2c0] sm:$0xff] }
  0x2d   :  { %522 = vmatpush3.msra.mxu1 %v69_v59  ;;  %488 = vmatprep.subr.mxu0 %v52_v60  ;;  %v142_v27 = vld [vmem:[#allocation2 + $0x350] sm:$0xff]  ;;  %v141_v31 = vld [vmem:[#allocation2 + $0x348] sm:$0xff]  ;;  %v156_v33 = vld [vmem:[#allocation2 + $0x3c0] sm:$0xff] }
  0x2e   :  { %523 = vmatprep.subr.mxu1 %v84_v61  ;;  %489 = vmatpush3.msra.mxu0 %v36_v62  ;;  %v108_v34 = vld [vmem:[#allocation2 + $0x240] sm:$0xff]  ;;  %v123_v36 = vld [vmem:[#allocation2 + $0x2b8] sm:$0xff]  ;;  %v122_v40 = vld [vmem:[#allocation2 + $0x2b0] sm:$0xff] }
  0x2f   :  { %235 = vmatprep.mubr.f32.mxu0 %v29_v63  ;;  %524 = vmatpush3.msra.mxu1 %v68_v0  ;;  %v140_v35 = vld [vmem:[#allocation2 + $0x340] sm:$0xff]  ;;  %v155_v37 = vld [vmem:[#allocation2 + $0x3b8] sm:$0xff]  ;;  %v154_v41 = vld [vmem:[#allocation2 + $0x3b0] sm:$0xff] }
  0x30   :  { %236 = vmatmul.mubr.f32.vlgmr.msra.gmra.mxu0 %v28_v1  ;;  %305 = vmatprep.mubr.f32.mxu1 %v31_v2  ;;  %v107_v38 = vld [vmem:[#allocation2 + $0x238] sm:$0xff]  ;;  %v106_v42 = vld [vmem:[#allocation2 + $0x230] sm:$0xff]  ;;  %v121_v44 = vld [vmem:[#allocation2 + $0x2a8] sm:$0xff] }
  0x31   :  { %528 = vmatprep.subr.mxu0 %v131_v3  ;;  %563 = vmatprep.subr.mxu1 %v163_v4  ;;  %v139_v39 = vld [vmem:[#allocation2 + $0x338] sm:$0xff]  ;;  %v138_v43 = vld [vmem:[#allocation2 + $0x330] sm:$0xff]  ;;  %v153_v45 = vld [vmem:[#allocation2 + $0x3a8] sm:$0xff] }
  0x32   :  { %306 = vmatmul.mubr.f32.vlgmr.msra.gmra.mxu1 %v30_v5  ;;  %529 = vmatpush3.msra.mxu0 %v115_v6  ;;  %v105_v46 = vld [vmem:[#allocation2 + $0x228] sm:$0xff]  ;;  %v120_v48 = vld [vmem:[#allocation2 + $0x2a0] sm:$0xff]  ;;  %v119_v52 = vld [vmem:[#allocation2 + $0x298] sm:$0xff] }
  0x33   :  { %564 = vmatpush3.msra.mxu1 %v147_v7  ;;  %530 = vmatprep.subr.mxu0 %v130_v8  ;;  %v137_v47 = vld [vmem:[#allocation2 + $0x328] sm:$0xff]  ;;  %v152_v49 = vld [vmem:[#allocation2 + $0x3a0] sm:$0xff]  ;;  %v151_v53 = vld [vmem:[#allocation2 + $0x398] sm:$0xff] }
  0x34   :  { %565 = vmatprep.subr.mxu1 %v162_v9  ;;  %531 = vmatpush3.msra.mxu0 %v114_v10  ;;  %v104_v50 = vld [vmem:[#allocation2 + $0x220] sm:$0xff]  ;;  %v103_v54 = vld [vmem:[#allocation2 + $0x218] sm:$0xff]  ;;  %v118_v56 = vld [vmem:[#allocation2 + $0x290] sm:$0xff] }
  0x35   :  { %566 = vmatpush3.msra.mxu1 %v146_v11  ;;  %532 = vmatprep.subr.mxu0 %v129_v12  ;;  %v136_v51 = vld [vmem:[#allocation2 + $0x320] sm:$0xff]  ;;  %v135_v55 = vld [vmem:[#allocation2 + $0x318] sm:$0xff]  ;;  %v150_v57 = vld [vmem:[#allocation2 + $0x390] sm:$0xff] }
  0x36   :  { %567 = vmatprep.subr.mxu1 %v161_v13  ;;  %533 = vmatpush3.msra.mxu0 %v113_v14  ;;  %v102_v58 = vld [vmem:[#allocation2 + $0x210] sm:$0xff]  ;;  %v117_v60 = vld [vmem:[#allocation2 + $0x288] sm:$0xff]  ;;  %v116_v0 = vld [vmem:[#allocation2 + $0x280] sm:$0xff] }
  0x37   :  { %568 = vmatpush3.msra.mxu1 %v145_v15  ;;  %534 = vmatprep.subr.mxu0 %v128_v16  ;;  %v134_v59 = vld [vmem:[#allocation2 + $0x310] sm:$0xff]  ;;  %v149_v61 = vld [vmem:[#allocation2 + $0x388] sm:$0xff]  ;;  %v148_v1 = vld [vmem:[#allocation2 + $0x380] sm:$0xff] }
  0x38   :  { %569 = vmatprep.subr.mxu1 %v160_v17  ;;  %535 = vmatpush3.msra.mxu0 %v112_v18  ;;  %v101_v62 = vld [vmem:[#allocation2 + $0x208] sm:$0xff]  ;;  %v100_v2 = vld [vmem:[#allocation2 + $0x200] sm:$0xff]  ;;  %v35_v5 = vld [vmem:[%s679_s0 + $0x38] sm:$0xff] }
  0x39   :  { %570 = vmatpush3.msra.mxu1 %v144_v19  ;;  %536 = vmatprep.subr.mxu0 %v127_v20  ;;  %v133_v63 = vld [vmem:[#allocation2 + $0x308] sm:$0xff]  ;;  %v132_v4 = vld [vmem:[#allocation2 + $0x300] sm:$0xff]  ;;  %v34_v7 = vld [vmem:[%s679_s0 + $0x30] sm:$0xff] }
  0x3a   :  { %571 = vmatprep.subr.mxu1 %v159_v21  ;;  %537 = vmatpush3.msra.mxu0 %v111_v22  ;;  %v33_v3 = vld [vmem:[%s679_s0 + $0x28] sm:$0xff]  ;;  %v32_v6 = vld [vmem:[%s679_s0 + $0x20] sm:$0xff] }
  0x3b   :  { %572 = vmatpush3.msra.mxu1 %v143_v23  ;;  %538 = vmatprep.subr.mxu0 %v126_v24  ;;  %v457_v12 = vld [vmem:[%s681_s2] ss:$0 sm:$0xff] }
  0x3c   :  { %573 = vmatprep.subr.mxu1 %v158_v25  ;;  %539 = vmatpush3.msra.mxu0 %v110_v26 }
  0x3d   :  { %574 = vmatpush3.msra.mxu1 %v142_v27  ;;  %540 = vmatprep.subr.mxu0 %v125_v28 }
  0x3e   :  { %575 = vmatprep.subr.mxu1 %v157_v29  ;;  %541 = vmatpush3.msra.mxu0 %v109_v30 }
  0x3f   :  { %576 = vmatpush3.msra.mxu1 %v141_v31  ;;  %542 = vmatprep.subr.mxu0 %v124_v32 }
  0x40   :  { %577 = vmatprep.subr.mxu1 %v156_v33  ;;  %543 = vmatpush3.msra.mxu0 %v108_v34 }
  0x41   :  { %578 = vmatpush3.msra.mxu1 %v140_v35  ;;  %544 = vmatprep.subr.mxu0 %v123_v36 }
  0x42   :  { %579 = vmatprep.subr.mxu1 %v155_v37  ;;  %545 = vmatpush3.msra.mxu0 %v107_v38 }
  0x43   :  { %580 = vmatpush3.msra.mxu1 %v139_v39  ;;  %546 = vmatprep.subr.mxu0 %v122_v40 }
  0x44   :  { %581 = vmatprep.subr.mxu1 %v154_v41  ;;  %547 = vmatpush3.msra.mxu0 %v106_v42 }
  0x45   :  { %582 = vmatpush3.msra.mxu1 %v138_v43  ;;  %548 = vmatprep.subr.mxu0 %v121_v44 }
  0x46   :  { %583 = vmatprep.subr.mxu1 %v153_v45  ;;  %549 = vmatpush3.msra.mxu0 %v105_v46 }
  0x47   :  { %584 = vmatpush3.msra.mxu1 %v137_v47  ;;  %550 = vmatprep.subr.mxu0 %v120_v48 }
  0x48   :  { %585 = vmatprep.subr.mxu1 %v152_v49  ;;  %551 = vmatpush3.msra.mxu0 %v104_v50 }
  0x49   :  { %586 = vmatpush3.msra.mxu1 %v136_v51  ;;  %552 = vmatprep.subr.mxu0 %v119_v52 }
  0x4a   :  { %587 = vmatprep.subr.mxu1 %v151_v53  ;;  %553 = vmatpush3.msra.mxu0 %v103_v54 }
  0x4b   :  { %588 = vmatpush3.msra.mxu1 %v135_v55  ;;  %554 = vmatprep.subr.mxu0 %v118_v56 }
  0x4c   :  { %589 = vmatprep.subr.mxu1 %v150_v57  ;;  %555 = vmatpush3.msra.mxu0 %v102_v58 }
  0x4d   :  { %590 = vmatpush3.msra.mxu1 %v134_v59  ;;  %556 = vmatprep.subr.mxu0 %v117_v60 }
  0x4e   :  { %591 = vmatprep.subr.mxu1 %v149_v61  ;;  %557 = vmatpush3.msra.mxu0 %v101_v62 }
  0x4f   :  { %592 = vmatpush3.msra.mxu1 %v133_v63  ;;  %558 = vmatprep.subr.mxu0 %v116_v0 }
  0x50   :  { %593 = vmatprep.subr.mxu1 %v148_v1  ;;  %559 = vmatpush3.msra.mxu0 %v100_v2 }
  0x51   :  { %375 = vmatprep.mubr.f32.mxu0 %v33_v3  ;;  %594 = vmatpush3.msra.mxu1 %v132_v4 }
  0x52   :  { %445 = vmatprep.mubr.f32.mxu1 %v35_v5  ;;  %376 = vmatmul.mubr.f32.vlgmr.msra.gmra.mxu0 %v32_v6 }
  0x53   :  { %446 = vmatmul.mubr.f32.vlgmr.msra.gmra.mxu1 %v34_v7 }
  0xf0   :  { %v490_v8 = vpop.f32.mrf.mxu0 }
  0xf2   :  { %v525_v9 = vpop.f32.mrf.mxu1  ;;  %v491_v10 = vpop.f32.mrf.mxu0 }
  0xf3   :  { %v492_v11 = vadd.f32 %v491_v10, %v490_v8 }
  0xf4   :  { %v526_v13 = vpop.f32.mrf.mxu1 }
  0xf5   :  { %v238_v14 = vadd.f32 %v492_v11, %v457_v12  ;;  %v527_v15 = vadd.f32 %v526_v13, %v525_v9 }
  0xf7   :  { %v308_v20 = vadd.f32 %v527_v15, %v238_v14 }
 0x112   :  { %v560_v16 = vpop.f32.mrf.mxu0 }
 0x113   :  { %v595_v17 = vpop.f32.mrf.mxu1 }
 0x114   :  { %v561_v18 = vpop.f32.mrf.mxu0 }
 0x115   :  { %v596_v19 = vpop.f32.mrf.mxu1  ;;  %v562_v21 = vadd.f32 %v561_v18, %v560_v16 }
 0x116   :  { %v597_v23 = vadd.f32 %v596_v19, %v595_v17 }
 0x117   :  { %v378_v22 = vadd.f32 %v562_v21, %v308_v20 }
 0x119   :  { %v448_v24 = vadd.f32 %v597_v23, %v378_v22 }
 0x11b   :  { %451 = vst [vmem:[%s682_s3] sm:$0xff] %v448_v24 }
 0x11c   :  { %456 = vsyncpa [#allocation3], 1 }

</bundles_post_ra>
